<compile_context>
chip_gen: v7x
topology: tpu7x:2x2x1
jax: 0.10.0
libtpu: 0.0.40
codegen_flags: <defaults>
</compile_context>

<pallas_src>
import jax
import jax.numpy as jnp
from jax.experimental import pallas as pl
from jax.experimental.pallas import tpu as pltpu

# ----------------------------- config (small synthetic shapes) -----------------------
B = 2             # batch
C_IN = 4          # input image channels
H = W = 16        # spatial
HW = H * W
C_FEAT = 32       # backbone feature channels
E = 8             # mask / kernel embedding dim
NUM_CLASSES = 5   # plane categories
C8 = 8            # classes padded to a full sublane group
N_INST = 4        # max GT instances per image (before padding)
N_PAD = 8         # instances padded to a full sublane group
DEPTH_ROW = 2 * E + C8          # 24
CO = 32           # head rows padded to 4 aligned sublane groups
ALPHA = 0.25      # focal alpha (gamma = 2 hardcoded as a square)
EPS = 1e-6

# Spatial tile (lanes per grid step). 8192 keeps live temps + scratch + double-buffered
# input tiles at a few MiB: inside v7x's 32 MiB scoped VMEM and v6e's default; on v5e the
# explicit vmem_limit_bytes below raises the 16 MiB scoped default.
MAX_HW_TILE = 8192


def _pick_hw_tile(hw):
    assert hw % 128 == 0, "spatial size (H*W) must be a multiple of 128 lanes"
    if hw <= MAX_HW_TILE:
        return hw
    t = MAX_HW_TILE
    while hw % t:
        t -= 128
    return t


# ----------------------------- fused net + criterion kernel --------------------------
def netloss_kernel(x_ref, xc_ref, wbb_ref, bbb_ref, wh_ref, bh_ref,
                   gtm_ref, gtd_ref, cls_ref, val_ref, area_ref,
                   out_ref,
                   kers_sc, corr_sc, inter_sc, p2_sc, focal_sc, dsq_sc, dcnt_sc):
    hw = pl.program_id(1)

    w_bb = wbb_ref[...]                     # (C_FEAT, C_IN) bf16
    b_bb = bbb_ref[...]                     # (C_FEAT, 1)    f32
    w_h = wh_ref[...]                       # (CO, C_FEAT)   bf16
    b_h = bh_ref[...]                       # (CO, 1)        f32
    val = val_ref[0]                        # (N_PAD, 1)     f32 in {0, 1}

    def heads_from(x_bf16):
        # 1x1-conv backbone + fused heads as channels-first matmuls (bf16 in, f32 acc).
        feat = jnp.dot(w_bb, x_bf16, preferred_element_type=jnp.float32) + b_bb
        feat = jnp.maximum(feat, 0.0)
        return jnp.dot(w_h, feat.astype(jnp.bfloat16),
                       preferred_element_type=jnp.float32) + b_h

    def focal_terms(z):
        # single exp per element; exact reciprocal (no approx bias over the dense grid)
        t = jnp.exp(-jnp.abs(z))
        inv = 1.0 / (1.0 + t)
        prob = jnp.where(z >= 0, inv, t * inv)            # sigmoid(z)
        bce_neg = jnp.maximum(z, 0.0) + jnp.log1p(t)      # -log(1 - sigmoid(z))
        bce_pos = bce_neg - z                             # -log(sigmoid(z))
        f_neg = (1.0 - ALPHA) * prob * prob * bce_neg
        f_pos = ALPHA * (1.0 - prob) * (1.0 - prob) * bce_pos
        return f_neg, f_pos

    # ---- per-image setup at the first HW tile: zero the lane-wise accumulators and
    #      resolve instance kernels + focal positive corrections from the center pixels.
    @pl.when(hw == 0)
    def _setup():
        inter_sc[...] = jnp.zeros_like(inter_sc)
        p2_sc[...] = jnp.zeros_like(p2_sc)
        focal_sc[...] = jnp.zeros_like(focal_sc)
        dsq_sc[...] = jnp.zeros_like(dsq_sc)
        dcnt_sc[...] = jnp.zeros_like(dcnt_sc)

        heads_c = heads_from(xc_ref[0])                            # (CO, N_PAD)
        kers_sc[...] = heads_c[E:2 * E, :].T                       # (N_PAD, E)  tiny 8x8 transpose
        cate_c = heads_c[2 * E:2 * E + C8, :].T                    # (N_PAD, C8)
        cls_lane = jax.lax.broadcasted_iota(jnp.int32, (N_PAD, C8), 1)
        cls_onehot = (cls_lane == cls_ref[0]).astype(jnp.float32)
        x_pos = jnp.sum(cate_c * cls_onehot, axis=-1, keepdims=True)   # (N_PAD, 1)
        fn_p, fp_p = focal_terms(x_pos)
        # padded instances have val=0, so they never contribute.
        corr_sc[...] = (fp_p - fn_p) * val
        # TODO(synk): two valid instances sharing the same (class, center) cell would apply
        # this neg->pos flip twice; the original matcher guarantees unique centers.

    # ---- main per-tile compute -------------------------------------------------------
    heads = heads_from(x_ref[0])                                   # (CO, T) f32
    mask_p = heads[0:E, :]                                         # (E, T)   8-aligned slice
    cate_p = heads[2 * E:2 * E + C8, :]                            # (C8, T)  8-aligned slice
    depth_p = heads[DEPTH_ROW:DEPTH_ROW + 1, :]                    # (1, T)   8-aligned start

    # dice partials: canonical (N, E) @ (E, T) matmul, lane-wise VPU accumulation only
    logits = jnp.dot(kers_sc[...].astype(jnp.bfloat16), mask_p.astype(jnp.bfloat16),
                     preferred_element_type=jnp.float32)           # (N_PAD, T)
    p = jax.nn.sigmoid(logits)
    gtm = gtm_ref[0].astype(jnp.float32)                           # bf16 in HBM, binary
    inter_sc[...] += p * gtm
    p2_sc[...] += p * p

    # dense focal negatives; padded class rows masked with a static (C8, 1) mask
    cls_row = jax.lax.broadcasted_iota(jnp.int32, (C8, 1), 0)
    cls_row_mask = (cls_row < NUM_CLASSES).astype(jnp.float32)
    f_neg_all, _ = focal_terms(cate_p)
    focal_sc[...] += f_neg_all * cls_row_mask

    # masked squared-error depth partials
    dg = gtd_ref[0]                                                # (1, T)
    vm = (dg > 0.0).astype(jnp.float32)
    diff = (depth_p - dg) * vm
    dsq_sc[...] += diff * diff
    dcnt_sc[...] += vm

    # ---- per-image finalize: one cross-lane reduce per term, lane-dense per-batch output
    @pl.when(hw == pl.num_programs(1) - 1)
    def _finalize():
        inter = jnp.sum(inter_sc[...], axis=-1, keepdims=True)     # (N_PAD, 1)
        p2 = jnp.sum(p2_sc[...], axis=-1, keepdims=True)
        dice = (2.0 * inter + EPS) / (p2 + area_ref[0] + EPS)      # area = sum(m^2), binary masks
        out_ref[0, 0:1, :] = jnp.full((1, 128), jnp.sum((1.0 - dice) * val), jnp.float32)
        out_ref[0, 1:2, :] = jnp.full((1, 128), jnp.sum(val), jnp.float32)
        out_ref[0, 2:3, :] = jnp.full((1, 128),
                                      jnp.sum(focal_sc[...]) + jnp.sum(corr_sc[...]),
                                      jnp.float32)
        out_ref[0, 3:4, :] = jnp.full((1, 128), jnp.sum(dsq_sc[...]), jnp.float32)
        out_ref[0, 4:5, :] = jnp.full((1, 128), jnp.sum(dcnt_sc[...]), jnp.float32)
        out_ref[0, 5:8, :] = jnp.zeros((3, 128), jnp.float32)
    # TODO(synk): PlaneRecNet's Lava (plane-parameter) loss and depth-gradient constraint
    # need plane geometry GT / camera intrinsics from the original config; not reproducible.


# ----------------------------- NetLoss.forward equivalent ----------------------------
def net_loss_forward(params, batched_images, batched_gt_instances, batched_gt_depths):
    B_, C_, H_, W_ = batched_images.shape
    HW_ = H_ * W_
    T = _pick_hw_tile(HW_)
    n_hw = HW_ // T

    # channels-first layout: HW rides the lanes; bf16 matmul inputs (f32 accumulation)
    x = batched_images.reshape(B_, C_, HW_).astype(jnp.bfloat16)
    w_bb = params['w_bb'].astype(jnp.bfloat16)                # (C_FEAT, C_IN)
    w_heads = params['w_heads'].astype(jnp.bfloat16)          # (CO, C_FEAT), rows pre-padded/aligned

    centers = batched_gt_instances['centers']                 # (B, N, 2) int (y, x)
    flat_idx = (centers[..., 0] * W_ + centers[..., 1]).astype(jnp.int32)
    classes = batched_gt_instances['classes'].astype(jnp.int32)
    valid = batched_gt_instances['valid'].astype(jnp.float32)

    # pad instances to N_PAD (full sublane group); padded rows get valid=0 and never contribute
    n_inst = flat_idx.shape[1]
    pad = N_PAD - n_inst
    flat_idx = jnp.pad(flat_idx, ((0, 0), (0, pad)))
    classes = jnp.pad(classes, ((0, 0), (0, pad)))
    valid = jnp.pad(valid, ((0, 0), (0, pad)))

    # tiny O(B*C*N_PAD) gather of the input pixels at instance centers: 1x1-conv heads are
    # per-pixel, so the kernel re-derives kernel_pred / cate_pred at GT centers once per image
    # -> the HW axis can be tiled with no second pass and no HW-wide in-kernel gather.
    x_centers = jnp.take_along_axis(x, flat_idx[:, None, :], axis=2)    # (B, C, N_PAD) bf16

    gt_masks = jnp.pad(batched_gt_instances['masks'].reshape(B_, n_inst, HW_),
                       ((0, 0), (0, pad), (0, 0)))
    areas = jnp.sum(gt_masks, axis=-1, keepdims=True).astype(jnp.float32)   # (B, N_PAD, 1)
    gt_masks = gt_masks.astype(jnp.bfloat16)                  # binary -> exact in bf16, 2x less HBM
    gt_depth = batched_gt_depths.reshape(B_, 1, HW_).astype(jnp.float32)

    sums = pl.pallas_call(
        netloss_kernel,
        out_shape=jax.ShapeDtypeStruct((B_, 8, 128), jnp.float32),
        grid=(B_, n_hw),
        in_specs=[
            pl.BlockSpec((1, C_, T), lambda b, h: (b, 0, h)),         # image tile (channels-first)
            pl.BlockSpec((1, C_, N_PAD), lambda b, h: (b, 0, 0)),     # center pixels
            pl.BlockSpec((C_FEAT, C_IN), lambda b, h: (0, 0)),        # backbone weight
            pl.BlockSpec((C_FEAT, 1), lambda b, h: (0, 0)),           # backbone bias
            pl.BlockSpec((CO, C_FEAT), lambda b, h: (0, 0)),          # fused head weight (32 rows)
            pl.BlockSpec((CO, 1), lambda b, h: (0, 0)),               # fused head bias
            pl.BlockSpec((1, N_PAD, T), lambda b, h: (b, 0, h)),      # gt instance masks (bf16)
            pl.BlockSpec((1, 1, T), lambda b, h: (b, 0, h)),          # gt depth tile
            pl.BlockSpec((1, N_PAD, 1), lambda b, h: (b, 0, 0)),      # class ids
            pl.BlockSpec((1, N_PAD, 1), lambda b, h: (b, 0, 0)),      # valid flags
            pl.BlockSpec((1, N_PAD, 1), lambda b, h: (b, 0, 0)),      # gt mask areas (= sum m^2)
        ],
        out_specs=pl.BlockSpec((1, 8, 128), lambda b, h: (b, 0, 0)),  # per-batch lane-dense partials
        scratch_shapes=[
            pltpu.VMEM((N_PAD, E), jnp.float32),     # instance dynamic-conv kernels
            pltpu.VMEM((N_PAD, 1), jnp.float32),     # focal positive corrections
            pltpu.VMEM((N_PAD, T), jnp.float32),     # dice intersection partials (lane-wise)
            pltpu.VMEM((N_PAD, T), jnp.float32),     # dice sum(p^2) partials (lane-wise)
            pltpu.VMEM((C8, T), jnp.float32),        # focal negative partials (lane-wise)
            pltpu.VMEM((1, T), jnp.float32),         # depth squared-error partials
            pltpu.VMEM((1, T), jnp.float32),         # depth valid-count partials
        ],
        compiler_params=pltpu.CompilerParams(
            dimension_semantics=("parallel", "arbitrary"),    # batch megacore-shardable; HW reduces
            vmem_limit_bytes=32 * 1024 * 1024),
    )(x, x_centers, w_bb, params['b_bb'], w_heads, params['b_heads'],
      gt_masks, gt_depth, classes[..., None], valid[..., None], areas)

    # tiny final reduction + normalization kept in the wrapper (a handful of scalar flops)
    total = jnp.sum(sums[:, :, 0], axis=0)                    # (8,)
    n_valid = jnp.maximum(total[1], 1.0)
    loss_ins = total[0] / n_valid
    loss_cate = total[2] / n_valid
    loss_depth = jnp.sqrt(total[3] / jnp.maximum(total[4], 1.0) + 1e-12)
    return {'loss_ins': loss_ins, 'loss_cate': loss_cate, 'loss_depth': loss_depth}


# ----------------------------- main ---------------------------------------------------
if __name__ == "__main__":
    key = jax.random.PRNGKey(0)
    ks = jax.random.split(key, 10)

    # deterministic synthetic parameters; head rows padded to CO=32 with zeroed pad rows
    rows = jnp.arange(CO)
    live_rows = ((rows < 2 * E + NUM_CLASSES) | (rows == DEPTH_ROW)).astype(jnp.float32)[:, None]
    params = {
        'w_bb': 0.1 * jax.random.normal(ks[0], (C_FEAT, C_IN), jnp.float32),
        'b_bb': 0.1 * jax.random.normal(ks[1], (C_FEAT, 1), jnp.float32),
        'w_heads': 0.1 * jax.random.normal(ks[2], (CO, C_FEAT), jnp.float32) * live_rows,
        'b_heads': 0.1 * jax.random.normal(ks[3], (CO, 1), jnp.float32) * live_rows,
    }

    # deterministic synthetic inputs
    batched_images = jax.random.normal(ks[4], (B, C_IN, H, W), jnp.float32)   # NCHW
    batched_gt_depths = jax.nn.relu(jax.random.normal(ks[5], (B, H, W))) + 0.5
    batched_gt_instances = {
        'centers': jax.random.randint(ks[6], (B, N_INST, 2), 0, H),
        'classes': jax.random.randint(ks[7], (B, N_INST), 0, NUM_CLASSES),
        'masks': (jax.random.uniform(ks[8], (B, N_INST, H, W)) > 0.7).astype(jnp.float32),
        'valid': jnp.ones((B, N_INST), jnp.float32),
    }

    losses = jax.jit(net_loss_forward)(params, batched_images,
                                       batched_gt_instances, batched_gt_depths)
    losses = jax.block_until_ready(losses)
    assert all(jnp.isfinite(v) for v in losses.values())
    print("KERNEL_OK")
</pallas_src>

<mosaic_0001>
module attributes {stable_mosaic.version = 11 : i64} {
  func.func @netloss_kernel(%arg0: i32, %arg1: i32, %arg2: memref<1x4x256xbf16, #tpu.memory_space<vmem>>, %arg3: memref<1x4x8xbf16, #tpu.memory_space<vmem>>, %arg4: memref<32x4xbf16, #tpu.memory_space<vmem>>, %arg5: memref<32x1xf32, #tpu.memory_space<vmem>>, %arg6: memref<32x32xbf16, #tpu.memory_space<vmem>>, %arg7: memref<32x1xf32, #tpu.memory_space<vmem>>, %arg8: memref<1x8x256xbf16, #tpu.memory_space<vmem>>, %arg9: memref<1x1x256xf32, #tpu.memory_space<vmem>>, %arg10: memref<1x8x1xi32, #tpu.memory_space<vmem>>, %arg11: memref<1x8x1xf32, #tpu.memory_space<vmem>>, %arg12: memref<1x8x1xf32, #tpu.memory_space<vmem>>, %arg13: memref<1x8x128xf32, #tpu.memory_space<vmem>>, %arg14: memref<8x8xf32, #tpu.memory_space<vmem>>, %arg15: memref<8x1xf32, #tpu.memory_space<vmem>>, %arg16: memref<8x256xf32, #tpu.memory_space<vmem>>, %arg17: memref<8x256xf32, #tpu.memory_space<vmem>>, %arg18: memref<8x256xf32, #tpu.memory_space<vmem>>, %arg19: memref<1x256xf32, #tpu.memory_space<vmem>>, %arg20: memref<1x256xf32, #tpu.memory_space<vmem>>) attributes {dimension_semantics = [#tpu.dimension_semantics<parallel>, #tpu.dimension_semantics<arbitrary>], iteration_bounds = array<i64: 2, 1>, scalar_prefetch = 0 : i64, scratch_operands = 7 : i64, tpu.core_type = #tpu.core_type<tc>, window_params = [{transform_indices = @transform_0, window_bounds = array<i64: 1, 4, 256>}, {transform_indices = @transform_1, window_bounds = array<i64: 1, 4, 8>}, {pipeline_mode = #tpu.pipeline_mode<synchronous>, transform_indices = @transform_2, window_bounds = array<i64: 32, 4>}, {pipeline_mode = #tpu.pipeline_mode<synchronous>, transform_indices = @transform_3, window_bounds = array<i64: 32, 1>}, {pipeline_mode = #tpu.pipeline_mode<synchronous>, transform_indices = @transform_4, window_bounds = array<i64: 32, 32>}, {pipeline_mode = #tpu.pipeline_mode<synchronous>, transform_indices = @transform_5, window_bounds = array<i64: 32, 1>}, {transform_indices = @transform_6, window_bounds = array<i64: 1, 8, 256>}, {transform_indices = @transform_7, window_bounds = array<i64: 1, 1, 256>}, {transform_indices = @transform_8, window_bounds = array<i64: 1, 8, 1>}, {transform_indices = @transform_9, window_bounds = array<i64: 1, 8, 1>}, {transform_indices = @transform_10, window_bounds = array<i64: 1, 8, 1>}, {transform_indices = @transform_11, window_bounds = array<i64: 1, 8, 128>}]} {
    %c0 = arith.constant 0 : index
    %c0_0 = arith.constant 0 : index
    %0 = vector.load %arg4[%c0, %c0_0] : memref<32x4xbf16, #tpu.memory_space<vmem>>, vector<32x4xbf16>
    %c0_1 = arith.constant 0 : index
    %c0_2 = arith.constant 0 : index
    %1 = vector.load %arg5[%c0_1, %c0_2] : memref<32x1xf32, #tpu.memory_space<vmem>>, vector<32x1xf32>
    %c0_3 = arith.constant 0 : index
    %c0_4 = arith.constant 0 : index
    %2 = vector.load %arg6[%c0_3, %c0_4] : memref<32x32xbf16, #tpu.memory_space<vmem>>, vector<32x32xbf16>
    %c0_5 = arith.constant 0 : index
    %c0_6 = arith.constant 0 : index
    %3 = vector.load %arg7[%c0_5, %c0_6] : memref<32x1xf32, #tpu.memory_space<vmem>>, vector<32x1xf32>
    %c0_7 = arith.constant 0 : index
    %c0_8 = arith.constant 0 : index
    %c0_9 = arith.constant 0 : index
    %4 = vector.load %arg11[%c0_7, %c0_8, %c0_9] : memref<1x8x1xf32, #tpu.memory_space<vmem>>, vector<1x8x1xf32>
    %5 = vector.shape_cast %4 : vector<1x8x1xf32> to vector<8x1xf32>
    %c0_i32 = arith.constant 0 : i32
    %6 = arith.cmpi eq, %arg1, %c0_i32 : i32
    %7 = arith.extui %6 : i1 to i32
    %c0_i32_10 = arith.constant 0 : i32
    %8 = arith.cmpi ne, %7, %c0_i32_10 : i32
    scf.if %8 {
      %cst_55 = arith.constant 0.000000e+00 : f32
      %91 = vector.broadcast %cst_55 : f32 to vector<8x256xf32>
      %c0_56 = arith.constant 0 : index
      %c0_57 = arith.constant 0 : index
      %92 = vector.load %arg16[%c0_56, %c0_57] : memref<8x256xf32, #tpu.memory_space<vmem>>, vector<8x256xf32>
      tpu.vector_store %arg16[%c0_56, %c0_57], %91 {strides = array<i32>} : memref<8x256xf32, #tpu.memory_space<vmem>>, vector<8x256xf32>,
      %cst_58 = arith.constant 0.000000e+00 : f32
      %93 = vector.broadcast %cst_58 : f32 to vector<8x256xf32>
      %c0_59 = arith.constant 0 : index
      %c0_60 = arith.constant 0 : index
      %94 = vector.load %arg17[%c0_59, %c0_60] : memref<8x256xf32, #tpu.memory_space<vmem>>, vector<8x256xf32>
      tpu.vector_store %arg17[%c0_59, %c0_60], %93 {strides = array<i32>} : memref<8x256xf32, #tpu.memory_space<vmem>>, vector<8x256xf32>,
      %cst_61 = arith.constant 0.000000e+00 : f32
      %95 = vector.broadcast %cst_61 : f32 to vector<8x256xf32>
      %c0_62 = arith.constant 0 : index
      %c0_63 = arith.constant 0 : index
      %96 = vector.load %arg18[%c0_62, %c0_63] : memref<8x256xf32, #tpu.memory_space<vmem>>, vector<8x256xf32>
      tpu.vector_store %arg18[%c0_62, %c0_63], %95 {strides = array<i32>} : memref<8x256xf32, #tpu.memory_space<vmem>>, vector<8x256xf32>,
      %cst_64 = arith.constant 0.000000e+00 : f32
      %97 = vector.broadcast %cst_64 : f32 to vector<1x256xf32>
      %c0_65 = arith.constant 0 : index
      %c0_66 = arith.constant 0 : index
      %98 = vector.load %arg19[%c0_65, %c0_66] : memref<1x256xf32, #tpu.memory_space<vmem>>, vector<1x256xf32>
      tpu.vector_store %arg19[%c0_65, %c0_66], %97 {strides = array<i32>} : memref<1x256xf32, #tpu.memory_space<vmem>>, vector<1x256xf32>,
      %cst_67 = arith.constant 0.000000e+00 : f32
      %99 = vector.broadcast %cst_67 : f32 to vector<1x256xf32>
      %c0_68 = arith.constant 0 : index
      %c0_69 = arith.constant 0 : index
      %100 = vector.load %arg20[%c0_68, %c0_69] : memref<1x256xf32, #tpu.memory_space<vmem>>, vector<1x256xf32>
      tpu.vector_store %arg20[%c0_68, %c0_69], %99 {strides = array<i32>} : memref<1x256xf32, #tpu.memory_space<vmem>>, vector<1x256xf32>,
      %c0_70 = arith.constant 0 : index
      %c0_71 = arith.constant 0 : index
      %c0_72 = arith.constant 0 : index
      %101 = vector.load %arg3[%c0_70, %c0_71, %c0_72] : memref<1x4x8xbf16, #tpu.memory_space<vmem>>, vector<1x4x8xbf16>
      %102 = vector.shape_cast %101 : vector<1x4x8xbf16> to vector<4x8xbf16>
      %cst_73 = arith.constant dense<0.000000e+00> : vector<32x8xf32>
      %103 = tpu.matmul %0, %102, %cst_73 {dimension_numbers = #tpu.dot_dimension_numbers<[1], [0], [0], [1], [0, 0, 1, 1], [], []>} : vector<32x4xbf16>, vector<4x8xbf16>, vector<32x8xf32> -> vector<32x8xf32>
      %104 = vector.broadcast %1 : vector<32x1xf32> to vector<32x8xf32>
      %105 = arith.addf %103, %104 : vector<32x8xf32>
      %cst_74 = arith.constant 0.000000e+00 : f32
      %106 = vector.broadcast %cst_74 : f32 to vector<32x8xf32>
      %107 = arith.maximumf %105, %106 : vector<32x8xf32>
      %108 = arith.truncf %107 : vector<32x8xf32> to vector<32x8xbf16>
      %cst_75 = arith.constant dense<0.000000e+00> : vector<32x8xf32>
      %109 = tpu.matmul %2, %108, %cst_75 {dimension_numbers = #tpu.dot_dimension_numbers<[1], [0], [0], [1], [0, 0, 1, 1], [], []>} : vector<32x32xbf16>, vector<32x8xbf16>, vector<32x8xf32> -> vector<32x8xf32>
      %110 = vector.broadcast %3 : vector<32x1xf32> to vector<32x8xf32>
      %111 = arith.addf %109, %110 : vector<32x8xf32>
      %112 = vector.extract_strided_slice %111 {offsets = [8, 0], sizes = [8, 8], strides = [1, 1]} : vector<32x8xf32> to vector<8x8xf32>
      %113 = tpu.transpose %112, [1, 0] : vector<8x8xf32> -> vector<8x8xf32>
      %c0_76 = arith.constant 0 : index
      %c0_77 = arith.constant 0 : index
      %114 = vector.load %arg14[%c0_76, %c0_77] : memref<8x8xf32, #tpu.memory_space<vmem>>, vector<8x8xf32>
      tpu.vector_store %arg14[%c0_76, %c0_77], %113 {strides = array<i32>} : memref<8x8xf32, #tpu.memory_space<vmem>>, vector<8x8xf32>,
      %115 = vector.extract_strided_slice %111 {offsets = [16, 0], sizes = [8, 8], strides = [1, 1]} : vector<32x8xf32> to vector<8x8xf32>
      %116 = tpu.transpose %115, [1, 0] : vector<8x8xf32> -> vector<8x8xf32>
      %117 = tpu.iota {dimensions = array<i32: 1>} : vector<8x8xi32>
      %c0_78 = arith.constant 0 : index
      %c0_79 = arith.constant 0 : index
      %c0_80 = arith.constant 0 : index
      %118 = vector.load %arg10[%c0_78, %c0_79, %c0_80] : memref<1x8x1xi32, #tpu.memory_space<vmem>>, vector<1x8x1xi32>
      %119 = vector.shape_cast %118 : vector<1x8x1xi32> to vector<8x1xi32>
      %120 = vector.broadcast %119 : vector<8x1xi32> to vector<8x8xi32>
      %121 = arith.cmpi eq, %117, %120 : vector<8x8xi32>
      %122 = arith.extui %121 : vector<8x8xi1> to vector<8x8xi32>
      %123 = arith.sitofp %122 : vector<8x8xi32> to vector<8x8xf32>
      %124 = arith.mulf %116, %123 : vector<8x8xf32>
      %cst_81 = arith.constant dense<0.000000e+00> : vector<8xf32>
      %125 = vector.multi_reduction <add>, %124, %cst_81 [1] : vector<8x8xf32> to vector<8xf32>
      %126 = vector.shape_cast %125 : vector<8xf32> to vector<8x1xf32>
      %127 = math.absf %126 : vector<8x1xf32>
      %cst_82 = arith.constant 0.000000e+00 : f32
      %128 = vector.broadcast %cst_82 : f32 to vector<8x1xf32>
      %129 = arith.subf %128, %127 : vector<8x1xf32>
      %130 = math.exp %129 : vector<8x1xf32>
      %cst_83 = arith.constant 1.000000e+00 : f32
      %131 = vector.broadcast %cst_83 : f32 to vector<8x1xf32>
      %132 = arith.addf %131, %130 : vector<8x1xf32>
      %cst_84 = arith.constant 1.000000e+00 : f32
      %133 = vector.broadcast %cst_84 : f32 to vector<8x1xf32>
      %134 = arith.divf %133, %132 : vector<8x1xf32>
      %cst_85 = arith.constant 0.000000e+00 : f32
      %135 = vector.broadcast %cst_85 : f32 to vector<8x1xf32>
      %136 = arith.cmpf oge, %126, %135 : vector<8x1xf32>
      %137 = arith.mulf %130, %134 : vector<8x1xf32>
      %138 = arith.select %136, %134, %137 : vector<8x1xi1>, vector<8x1xf32>
      %cst_86 = arith.constant 0.000000e+00 : f32
      %139 = vector.broadcast %cst_86 : f32 to vector<8x1xf32>
      %140 = arith.maximumf %126, %139 : vector<8x1xf32>
      %141 = math.log1p %130 : vector<8x1xf32>
      %142 = arith.addf %140, %141 : vector<8x1xf32>
      %143 = arith.subf %142, %126 : vector<8x1xf32>
      %cst_87 = arith.constant 7.500000e-01 : f32
      %144 = vector.broadcast %cst_87 : f32 to vector<8x1xf32>
      %145 = arith.mulf %144, %138 : vector<8x1xf32>
      %146 = arith.mulf %145, %138 : vector<8x1xf32>
      %147 = arith.mulf %146, %142 : vector<8x1xf32>
      %cst_88 = arith.constant 1.000000e+00 : f32
      %148 = vector.broadcast %cst_88 : f32 to vector<8x1xf32>
      %149 = arith.subf %148, %138 : vector<8x1xf32>
      %cst_89 = arith.constant 2.500000e-01 : f32
      %150 = vector.broadcast %cst_89 : f32 to vector<8x1xf32>
      %151 = arith.mulf %150, %149 : vector<8x1xf32>
      %cst_90 = arith.constant 1.000000e+00 : f32
      %152 = vector.broadcast %cst_90 : f32 to vector<8x1xf32>
      %153 = arith.subf %152, %138 : vector<8x1xf32>
      %154 = arith.mulf %151, %153 : vector<8x1xf32>
      %155 = arith.mulf %154, %143 : vector<8x1xf32>
      %156 = arith.subf %155, %147 : vector<8x1xf32>
      %157 = arith.mulf %156, %5 : vector<8x1xf32>
      %c0_91 = arith.constant 0 : index
      %c0_92 = arith.constant 0 : index
      %158 = vector.load %arg15[%c0_91, %c0_92] : memref<8x1xf32, #tpu.memory_space<vmem>>, vector<8x1xf32>
      tpu.vector_store %arg15[%c0_91, %c0_92], %157 {strides = array<i32>} : memref<8x1xf32, #tpu.memory_space<vmem>>, vector<8x1xf32>,
    } else {
    }
    %c0_11 = arith.constant 0 : index
    %c0_12 = arith.constant 0 : index
    %c0_13 = arith.constant 0 : index
    %9 = vector.load %arg2[%c0_11, %c0_12, %c0_13] : memref<1x4x256xbf16, #tpu.memory_space<vmem>>, vector<1x4x256xbf16>
    %10 = vector.shape_cast %9 : vector<1x4x256xbf16> to vector<4x256xbf16>
    %cst = arith.constant dense<0.000000e+00> : vector<32x256xf32>
    %11 = tpu.matmul %0, %10, %cst {dimension_numbers = #tpu.dot_dimension_numbers<[1], [0], [0], [1], [0, 0, 1, 1], [], []>} : vector<32x4xbf16>, vector<4x256xbf16>, vector<32x256xf32> -> vector<32x256xf32>
    %12 = vector.broadcast %1 : vector<32x1xf32> to vector<32x256xf32>
    %13 = arith.addf %11, %12 : vector<32x256xf32>
    %cst_14 = arith.constant 0.000000e+00 : f32
    %14 = vector.broadcast %cst_14 : f32 to vector<32x256xf32>
    %15 = arith.maximumf %13, %14 : vector<32x256xf32>
    %16 = arith.truncf %15 : vector<32x256xf32> to vector<32x256xbf16>
    %cst_15 = arith.constant dense<0.000000e+00> : vector<32x256xf32>
    %17 = tpu.matmul %2, %16, %cst_15 {dimension_numbers = #tpu.dot_dimension_numbers<[1], [0], [0], [1], [0, 0, 1, 1], [], []>} : vector<32x32xbf16>, vector<32x256xbf16>, vector<32x256xf32> -> vector<32x256xf32>
    %18 = vector.broadcast %3 : vector<32x1xf32> to vector<32x256xf32>
    %19 = arith.addf %17, %18 : vector<32x256xf32>
    %20 = vector.extract_strided_slice %19 {offsets = [0, 0], sizes = [8, 256], strides = [1, 1]} : vector<32x256xf32> to vector<8x256xf32>
    %21 = vector.extract_strided_slice %19 {offsets = [16, 0], sizes = [8, 256], strides = [1, 1]} : vector<32x256xf32> to vector<8x256xf32>
    %22 = vector.extract_strided_slice %19 {offsets = [24, 0], sizes = [1, 256], strides = [1, 1]} : vector<32x256xf32> to vector<1x256xf32>
    %c0_16 = arith.constant 0 : index
    %c0_17 = arith.constant 0 : index
    %23 = vector.load %arg14[%c0_16, %c0_17] : memref<8x8xf32, #tpu.memory_space<vmem>>, vector<8x8xf32>
    %24 = arith.truncf %23 : vector<8x8xf32> to vector<8x8xbf16>
    %25 = arith.truncf %20 : vector<8x256xf32> to vector<8x256xbf16>
    %cst_18 = arith.constant dense<0.000000e+00> : vector<8x256xf32>
    %26 = tpu.matmul %24, %25, %cst_18 {dimension_numbers = #tpu.dot_dimension_numbers<[1], [0], [0], [1], [0, 0, 1, 1], [], []>} : vector<8x8xbf16>, vector<8x256xbf16>, vector<8x256xf32> -> vector<8x256xf32>
    %27 = arith.negf %26 : vector<8x256xf32>
    %28 = math.exp %27 : vector<8x256xf32>
    %cst_19 = arith.constant 1.000000e+00 : f32
    %29 = vector.broadcast %cst_19 : f32 to vector<8x256xf32>
    %30 = arith.addf %29, %28 : vector<8x256xf32>
    %31 = arith.divf %29, %30 : vector<8x256xf32>
    %c0_20 = arith.constant 0 : index
    %c0_21 = arith.constant 0 : index
    %c0_22 = arith.constant 0 : index
    %32 = vector.load %arg8[%c0_20, %c0_21, %c0_22] : memref<1x8x256xbf16, #tpu.memory_space<vmem>>, vector<1x8x256xbf16>
    %33 = vector.shape_cast %32 : vector<1x8x256xbf16> to vector<8x256xbf16>
    %34 = arith.extf %33 : vector<8x256xbf16> to vector<8x256xf32>
    %c0_23 = arith.constant 0 : index
    %c0_24 = arith.constant 0 : index
    %35 = vector.load %arg16[%c0_23, %c0_24] : memref<8x256xf32, #tpu.memory_space<vmem>>, vector<8x256xf32>
    %36 = arith.mulf %31, %34 : vector<8x256xf32>
    %37 = arith.addf %35, %36 : vector<8x256xf32>
    %c0_25 = arith.constant 0 : index
    %c0_26 = arith.constant 0 : index
    %38 = vector.load %arg16[%c0_25, %c0_26] : memref<8x256xf32, #tpu.memory_space<vmem>>, vector<8x256xf32>
    tpu.vector_store %arg16[%c0_25, %c0_26], %37 {strides = array<i32>} : memref<8x256xf32, #tpu.memory_space<vmem>>, vector<8x256xf32>,
    %c0_27 = arith.constant 0 : index
    %c0_28 = arith.constant 0 : index
    %39 = vector.load %arg17[%c0_27, %c0_28] : memref<8x256xf32, #tpu.memory_space<vmem>>, vector<8x256xf32>
    %40 = arith.mulf %31, %31 : vector<8x256xf32>
    %41 = arith.addf %39, %40 : vector<8x256xf32>
    %c0_29 = arith.constant 0 : index
    %c0_30 = arith.constant 0 : index
    %42 = vector.load %arg17[%c0_29, %c0_30] : memref<8x256xf32, #tpu.memory_space<vmem>>, vector<8x256xf32>
    tpu.vector_store %arg17[%c0_29, %c0_30], %41 {strides = array<i32>} : memref<8x256xf32, #tpu.memory_space<vmem>>, vector<8x256xf32>,
    %43 = tpu.iota {dimensions = array<i32: 0>} : vector<8x1xi32>
    %c5_i32 = arith.constant 5 : i32
    %44 = vector.broadcast %c5_i32 : i32 to vector<8x1xi32>
    %45 = arith.cmpi slt, %43, %44 : vector<8x1xi32>
    %46 = arith.extui %45 : vector<8x1xi1> to vector<8x1xi32>
    %47 = arith.sitofp %46 : vector<8x1xi32> to vector<8x1xf32>
    %48 = math.absf %21 : vector<8x256xf32>
    %cst_31 = arith.constant 0.000000e+00 : f32
    %49 = vector.broadcast %cst_31 : f32 to vector<8x256xf32>
    %50 = arith.subf %49, %48 : vector<8x256xf32>
    %51 = math.exp %50 : vector<8x256xf32>
    %cst_32 = arith.constant 1.000000e+00 : f32
    %52 = vector.broadcast %cst_32 : f32 to vector<8x256xf32>
    %53 = arith.addf %52, %51 : vector<8x256xf32>
    %cst_33 = arith.constant 1.000000e+00 : f32
    %54 = vector.broadcast %cst_33 : f32 to vector<8x256xf32>
    %55 = arith.divf %54, %53 : vector<8x256xf32>
    %cst_34 = arith.constant 0.000000e+00 : f32
    %56 = vector.broadcast %cst_34 : f32 to vector<8x256xf32>
    %57 = arith.cmpf oge, %21, %56 : vector<8x256xf32>
    %58 = arith.mulf %51, %55 : vector<8x256xf32>
    %59 = arith.select %57, %55, %58 : vector<8x256xi1>, vector<8x256xf32>
    %cst_35 = arith.constant 0.000000e+00 : f32
    %60 = vector.broadcast %cst_35 : f32 to vector<8x256xf32>
    %61 = arith.maximumf %21, %60 : vector<8x256xf32>
    %62 = math.log1p %51 : vector<8x256xf32>
    %63 = arith.addf %61, %62 : vector<8x256xf32>
    %cst_36 = arith.constant 7.500000e-01 : f32
    %64 = vector.broadcast %cst_36 : f32 to vector<8x256xf32>
    %65 = arith.mulf %64, %59 : vector<8x256xf32>
    %66 = arith.mulf %65, %59 : vector<8x256xf32>
    %67 = arith.mulf %66, %63 : vector<8x256xf32>
    %c0_37 = arith.constant 0 : index
    %c0_38 = arith.constant 0 : index
    %68 = vector.load %arg18[%c0_37, %c0_38] : memref<8x256xf32, #tpu.memory_space<vmem>>, vector<8x256xf32>
    %69 = vector.broadcast %47 : vector<8x1xf32> to vector<8x256xf32>
    %70 = arith.mulf %67, %69 : vector<8x256xf32>
    %71 = arith.addf %68, %70 : vector<8x256xf32>
    %c0_39 = arith.constant 0 : index
    %c0_40 = arith.constant 0 : index
    %72 = vector.load %arg18[%c0_39, %c0_40] : memref<8x256xf32, #tpu.memory_space<vmem>>, vector<8x256xf32>
    tpu.vector_store %arg18[%c0_39, %c0_40], %71 {strides = array<i32>} : memref<8x256xf32, #tpu.memory_space<vmem>>, vector<8x256xf32>,
    %c0_41 = arith.constant 0 : index
    %c0_42 = arith.constant 0 : index
    %c0_43 = arith.constant 0 : index
    %73 = vector.load %arg9[%c0_41, %c0_42, %c0_43] : memref<1x1x256xf32, #tpu.memory_space<vmem>>, vector<1x1x256xf32>
    %74 = vector.shape_cast %73 : vector<1x1x256xf32> to vector<1x256xf32>
    %cst_44 = arith.constant 0.000000e+00 : f32
    %75 = vector.broadcast %cst_44 : f32 to vector<1x256xf32>
    %76 = arith.cmpf ogt, %74, %75 : vector<1x256xf32>
    %77 = arith.extui %76 : vector<1x256xi1> to vector<1x256xi32>
    %78 = arith.sitofp %77 : vector<1x256xi32> to vector<1x256xf32>
    %79 = arith.subf %22, %74 : vector<1x256xf32>
    %80 = arith.mulf %79, %78 : vector<1x256xf32>
    %c0_45 = arith.constant 0 : index
    %c0_46 = arith.constant 0 : index
    %81 = vector.load %arg19[%c0_45, %c0_46] : memref<1x256xf32, #tpu.memory_space<vmem>>, vector<1x256xf32>
    %82 = arith.mulf %80, %80 : vector<1x256xf32>
    %83 = arith.addf %81, %82 : vector<1x256xf32>
    %c0_47 = arith.constant 0 : index
    %c0_48 = arith.constant 0 : index
    %84 = vector.load %arg19[%c0_47, %c0_48] : memref<1x256xf32, #tpu.memory_space<vmem>>, vector<1x256xf32>
    tpu.vector_store %arg19[%c0_47, %c0_48], %83 {strides = array<i32>} : memref<1x256xf32, #tpu.memory_space<vmem>>, vector<1x256xf32>,
    %c0_49 = arith.constant 0 : index
    %c0_50 = arith.constant 0 : index
    %85 = vector.load %arg20[%c0_49, %c0_50] : memref<1x256xf32, #tpu.memory_space<vmem>>, vector<1x256xf32>
    %86 = arith.addf %85, %78 : vector<1x256xf32>
    %c0_51 = arith.constant 0 : index
    %c0_52 = arith.constant 0 : index
    %87 = vector.load %arg20[%c0_51, %c0_52] : memref<1x256xf32, #tpu.memory_space<vmem>>, vector<1x256xf32>
    tpu.vector_store %arg20[%c0_51, %c0_52], %86 {strides = array<i32>} : memref<1x256xf32, #tpu.memory_space<vmem>>, vector<1x256xf32>,
    %c0_i32_53 = arith.constant 0 : i32
    %88 = arith.cmpi eq, %arg1, %c0_i32_53 : i32
    %89 = arith.extui %88 : i1 to i32
    %c0_i32_54 = arith.constant 0 : i32
    %90 = arith.cmpi ne, %89, %c0_i32_54 : i32
    scf.if %90 {
      %c0_55 = arith.constant 0 : index
      %c0_56 = arith.constant 0 : index
      %91 = vector.load %arg16[%c0_55, %c0_56] : memref<8x256xf32, #tpu.memory_space<vmem>>, vector<8x256xf32>
      %cst_57 = arith.constant dense<0.000000e+00> : vector<8xf32>
      %92 = vector.multi_reduction <add>, %91, %cst_57 [1] : vector<8x256xf32> to vector<8xf32>
      %93 = vector.shape_cast %92 : vector<8xf32> to vector<8x1xf32>
      %c0_58 = arith.constant 0 : index
      %c0_59 = arith.constant 0 : index
      %94 = vector.load %arg17[%c0_58, %c0_59] : memref<8x256xf32, #tpu.memory_space<vmem>>, vector<8x256xf32>
      %cst_60 = arith.constant dense<0.000000e+00> : vector<8xf32>
      %95 = vector.multi_reduction <add>, %94, %cst_60 [1] : vector<8x256xf32> to vector<8xf32>
      %96 = vector.shape_cast %95 : vector<8xf32> to vector<8x1xf32>
      %cst_61 = arith.constant 2.000000e+00 : f32
      %97 = vector.broadcast %cst_61 : f32 to vector<8x1xf32>
      %98 = arith.mulf %97, %93 : vector<8x1xf32>
      %cst_62 = arith.constant 9.99999997E-7 : f32
      %99 = vector.broadcast %cst_62 : f32 to vector<8x1xf32>
      %100 = arith.addf %98, %99 : vector<8x1xf32>
      %c0_63 = arith.constant 0 : index
      %c0_64 = arith.constant 0 : index
      %c0_65 = arith.constant 0 : index
      %101 = vector.load %arg12[%c0_63, %c0_64, %c0_65] : memref<1x8x1xf32, #tpu.memory_space<vmem>>, vector<1x8x1xf32>
      %102 = vector.shape_cast %101 : vector<1x8x1xf32> to vector<8x1xf32>
      %103 = arith.addf %96, %102 : vector<8x1xf32>
      %cst_66 = arith.constant 9.99999997E-7 : f32
      %104 = vector.broadcast %cst_66 : f32 to vector<8x1xf32>
      %105 = arith.addf %103, %104 : vector<8x1xf32>
      %106 = arith.divf %100, %105 : vector<8x1xf32>
      %cst_67 = arith.constant 1.000000e+00 : f32
      %107 = vector.broadcast %cst_67 : f32 to vector<8x1xf32>
      %108 = arith.subf %107, %106 : vector<8x1xf32>
      %109 = arith.mulf %108, %5 : vector<8x1xf32>
      %110 = vector.shape_cast %109 : vector<8x1xf32> to vector<1x8x1xf32>
      %cst_68 = arith.constant dense<0.000000e+00> : vector<1xf32>
      %111 = vector.multi_reduction <add>, %110, %cst_68 [1, 2] : vector<1x8x1xf32> to vector<1xf32>
      %112 = vector.shape_cast %111 : vector<1xf32> to vector<1x1x1xf32>
      %113 = vector.extract %112[0, 0, 0] : f32 from vector<1x1x1xf32>
      %114 = vector.broadcast %113 : f32 to vector<1x128xf32>
      %c0_69 = arith.constant 0 : index
      %c0_70 = arith.constant 0 : index
      %c0_71 = arith.constant 0 : index
      %115 = vector.load %arg13[%c0_69, %c0_70, %c0_71] : memref<1x8x128xf32, #tpu.memory_space<vmem>>, vector<1x1x128xf32>
      %116 = vector.shape_cast %115 : vector<1x1x128xf32> to vector<1x128xf32>
      %117 = vector.shape_cast %114 : vector<1x128xf32> to vector<1x1x128xf32>
      tpu.vector_store %arg13[%c0_69, %c0_70, %c0_71], %117 {strides = array<i32>} : memref<1x8x128xf32, #tpu.memory_space<vmem>>, vector<1x1x128xf32>,
      %118 = vector.shape_cast %5 : vector<8x1xf32> to vector<1x8x1xf32>
      %cst_72 = arith.constant dense<0.000000e+00> : vector<1xf32>
      %119 = vector.multi_reduction <add>, %118, %cst_72 [1, 2] : vector<1x8x1xf32> to vector<1xf32>
      %120 = vector.shape_cast %119 : vector<1xf32> to vector<1x1x1xf32>
      %121 = vector.extract %120[0, 0, 0] : f32 from vector<1x1x1xf32>
      %122 = vector.broadcast %121 : f32 to vector<1x128xf32>
      %c0_73 = arith.constant 0 : index
      %c1 = arith.constant 1 : index
      %c0_74 = arith.constant 0 : index
      %123 = vector.load %arg13[%c0_73, %c1, %c0_74] : memref<1x8x128xf32, #tpu.memory_space<vmem>>, vector<1x1x128xf32>
      %124 = vector.shape_cast %123 : vector<1x1x128xf32> to vector<1x128xf32>
      %125 = vector.shape_cast %122 : vector<1x128xf32> to vector<1x1x128xf32>
      tpu.vector_store %arg13[%c0_73, %c1, %c0_74], %125 {strides = array<i32>} : memref<1x8x128xf32, #tpu.memory_space<vmem>>, vector<1x1x128xf32>,
      %c0_75 = arith.constant 0 : index
      %c0_76 = arith.constant 0 : index
      %126 = vector.load %arg18[%c0_75, %c0_76] : memref<8x256xf32, #tpu.memory_space<vmem>>, vector<8x256xf32>
      %127 = vector.shape_cast %126 : vector<8x256xf32> to vector<1x8x256xf32>
      %cst_77 = arith.constant dense<0.000000e+00> : vector<1xf32>
      %128 = vector.multi_reduction <add>, %127, %cst_77 [1, 2] : vector<1x8x256xf32> to vector<1xf32>
      %129 = vector.shape_cast %128 : vector<1xf32> to vector<1x1x1xf32>
      %130 = vector.extract %129[0, 0, 0] : f32 from vector<1x1x1xf32>
      %c0_78 = arith.constant 0 : index
      %c0_79 = arith.constant 0 : index
      %131 = vector.load %arg15[%c0_78, %c0_79] : memref<8x1xf32, #tpu.memory_space<vmem>>, vector<8x1xf32>
      %132 = vector.shape_cast %131 : vector<8x1xf32> to vector<1x8x1xf32>
      %cst_80 = arith.constant dense<0.000000e+00> : vector<1xf32>
      %133 = vector.multi_reduction <add>, %132, %cst_80 [1, 2] : vector<1x8x1xf32> to vector<1xf32>
      %134 = vector.shape_cast %133 : vector<1xf32> to vector<1x1x1xf32>
      %135 = vector.extract %134[0, 0, 0] : f32 from vector<1x1x1xf32>
      %136 = arith.addf %130, %135 : f32
      %137 = vector.broadcast %136 : f32 to vector<1x128xf32>
      %c0_81 = arith.constant 0 : index
      %c2 = arith.constant 2 : index
      %c0_82 = arith.constant 0 : index
      %138 = vector.load %arg13[%c0_81, %c2, %c0_82] : memref<1x8x128xf32, #tpu.memory_space<vmem>>, vector<1x1x128xf32>
      %139 = vector.shape_cast %138 : vector<1x1x128xf32> to vector<1x128xf32>
      %140 = vector.shape_cast %137 : vector<1x128xf32> to vector<1x1x128xf32>
      tpu.vector_store %arg13[%c0_81, %c2, %c0_82], %140 {strides = array<i32>} : memref<1x8x128xf32, #tpu.memory_space<vmem>>, vector<1x1x128xf32>,
      %c0_83 = arith.constant 0 : index
      %c0_84 = arith.constant 0 : index
      %141 = vector.load %arg19[%c0_83, %c0_84] : memref<1x256xf32, #tpu.memory_space<vmem>>, vector<1x256xf32>
      %142 = vector.shape_cast %141 : vector<1x256xf32> to vector<1x1x256xf32>
      %cst_85 = arith.constant dense<0.000000e+00> : vector<1xf32>
      %143 = vector.multi_reduction <add>, %142, %cst_85 [1, 2] : vector<1x1x256xf32> to vector<1xf32>
      %144 = vector.shape_cast %143 : vector<1xf32> to vector<1x1x1xf32>
      %145 = vector.extract %144[0, 0, 0] : f32 from vector<1x1x1xf32>
      %146 = vector.broadcast %145 : f32 to vector<1x128xf32>
      %c0_86 = arith.constant 0 : index
      %c3 = arith.constant 3 : index
      %c0_87 = arith.constant 0 : index
      %147 = vector.load %arg13[%c0_86, %c3, %c0_87] : memref<1x8x128xf32, #tpu.memory_space<vmem>>, vector<1x1x128xf32>
      %148 = vector.shape_cast %147 : vector<1x1x128xf32> to vector<1x128xf32>
      %149 = vector.shape_cast %146 : vector<1x128xf32> to vector<1x1x128xf32>
      tpu.vector_store %arg13[%c0_86, %c3, %c0_87], %149 {strides = array<i32>} : memref<1x8x128xf32, #tpu.memory_space<vmem>>, vector<1x1x128xf32>,
      %c0_88 = arith.constant 0 : index
      %c0_89 = arith.constant 0 : index
      %150 = vector.load %arg20[%c0_88, %c0_89] : memref<1x256xf32, #tpu.memory_space<vmem>>, vector<1x256xf32>
      %151 = vector.shape_cast %150 : vector<1x256xf32> to vector<1x1x256xf32>
      %cst_90 = arith.constant dense<0.000000e+00> : vector<1xf32>
      %152 = vector.multi_reduction <add>, %151, %cst_90 [1, 2] : vector<1x1x256xf32> to vector<1xf32>
      %153 = vector.shape_cast %152 : vector<1xf32> to vector<1x1x1xf32>
      %154 = vector.extract %153[0, 0, 0] : f32 from vector<1x1x1xf32>
      %155 = vector.broadcast %154 : f32 to vector<1x128xf32>
      %c0_91 = arith.constant 0 : index
      %c4 = arith.constant 4 : index
      %c0_92 = arith.constant 0 : index
      %156 = vector.load %arg13[%c0_91, %c4, %c0_92] : memref<1x8x128xf32, #tpu.memory_space<vmem>>, vector<1x1x128xf32>
      %157 = vector.shape_cast %156 : vector<1x1x128xf32> to vector<1x128xf32>
      %158 = vector.shape_cast %155 : vector<1x128xf32> to vector<1x1x128xf32>
      tpu.vector_store %arg13[%c0_91, %c4, %c0_92], %158 {strides = array<i32>} : memref<1x8x128xf32, #tpu.memory_space<vmem>>, vector<1x1x128xf32>,
      %cst_93 = arith.constant 0.000000e+00 : f32
      %159 = vector.broadcast %cst_93 : f32 to vector<3x128xf32>
      %c0_94 = arith.constant 0 : index
      %c5 = arith.constant 5 : index
      %c0_95 = arith.constant 0 : index
      %160 = vector.load %arg13[%c0_94, %c5, %c0_95] : memref<1x8x128xf32, #tpu.memory_space<vmem>>, vector<1x3x128xf32>
      %161 = vector.shape_cast %160 : vector<1x3x128xf32> to vector<3x128xf32>
      %162 = vector.shape_cast %159 : vector<3x128xf32> to vector<1x3x128xf32>
      tpu.vector_store %arg13[%c0_94, %c5, %c0_95], %162 {strides = array<i32>} : memref<1x8x128xf32, #tpu.memory_space<vmem>>, vector<1x3x128xf32>,
    } else {
    }
    return
  }
  func.func @transform_0(%arg0: i32, %arg1: i32) -> (i32, i32, i32) {
    %c0_i32 = arith.constant 0 : i32
    %c0_i32_0 = arith.constant 0 : i32
    return %arg0, %c0_i32, %arg1 : i32, i32, i32
  }
  func.func @transform_1(%arg0: i32, %arg1: i32) -> (i32, i32, i32) {
    %c0_i32 = arith.constant 0 : i32
    %c0_i32_0 = arith.constant 0 : i32
    %c0_i32_1 = arith.constant 0 : i32
    return %arg0, %c0_i32, %c0_i32_0 : i32, i32, i32
  }
  func.func @transform_2(%arg0: i32, %arg1: i32) -> (i32, i32) {
    %c0_i32 = arith.constant 0 : i32
    %c0_i32_0 = arith.constant 0 : i32
    %c0_i32_1 = arith.constant 0 : i32
    return %c0_i32, %c0_i32_0 : i32, i32
  }
  func.func @transform_3(%arg0: i32, %arg1: i32) -> (i32, i32) {
    %c0_i32 = arith.constant 0 : i32
    %c0_i32_0 = arith.constant 0 : i32
    %c0_i32_1 = arith.constant 0 : i32
    return %c0_i32, %c0_i32_0 : i32, i32
  }
  func.func @transform_4(%arg0: i32, %arg1: i32) -> (i32, i32) {
    %c0_i32 = arith.constant 0 : i32
    %c0_i32_0 = arith.constant 0 : i32
    %c0_i32_1 = arith.constant 0 : i32
    return %c0_i32, %c0_i32_0 : i32, i32
  }
  func.func @transform_5(%arg0: i32, %arg1: i32) -> (i32, i32) {
    %c0_i32 = arith.constant 0 : i32
    %c0_i32_0 = arith.constant 0 : i32
    %c0_i32_1 = arith.constant 0 : i32
    return %c0_i32, %c0_i32_0 : i32, i32
  }
  func.func @transform_6(%arg0: i32, %arg1: i32) -> (i32, i32, i32) {
    %c0_i32 = arith.constant 0 : i32
    %c0_i32_0 = arith.constant 0 : i32
    return %arg0, %c0_i32, %arg1 : i32, i32, i32
  }
  func.func @transform_7(%arg0: i32, %arg1: i32) -> (i32, i32, i32) {
    %c0_i32 = arith.constant 0 : i32
    %c0_i32_0 = arith.constant 0 : i32
    return %arg0, %c0_i32, %arg1 : i32, i32, i32
  }
  func.func @transform_8(%arg0: i32, %arg1: i32) -> (i32, i32, i32) {
    %c0_i32 = arith.constant 0 : i32
    %c0_i32_0 = arith.constant 0 : i32
    %c0_i32_1 = arith.constant 0 : i32
    return %arg0, %c0_i32, %c0_i32_0 : i32, i32, i32
  }
  func.func @transform_9(%arg0: i32, %arg1: i32) -> (i32, i32, i32) {
    %c0_i32 = arith.constant 0 : i32
    %c0_i32_0 = arith.constant 0 : i32
    %c0_i32_1 = arith.constant 0 : i32
    return %arg0, %c0_i32, %c0_i32_0 : i32, i32, i32
  }
  func.func @transform_10(%arg0: i32, %arg1: i32) -> (i32, i32, i32) {
    %c0_i32 = arith.constant 0 : i32
    %c0_i32_0 = arith.constant 0 : i32
    %c0_i32_1 = arith.constant 0 : i32
    return %arg0, %c0_i32, %c0_i32_0 : i32, i32, i32
  }
  func.func @transform_11(%arg0: i32, %arg1: i32) -> (i32, i32, i32) {
    %c0_i32 = arith.constant 0 : i32
    %c0_i32_0 = arith.constant 0 : i32
    %c0_i32_1 = arith.constant 0 : i32
    return %arg0, %c0_i32, %c0_i32_0 : i32, i32, i32
  }
}

</mosaic_0001>

<bundles_post_ra>
// kernel: net_loss_forward.1
= control target key start
LH: loop header
LB: loop body
LE: loop exit
PB: predicated region body
PF: predicated region fallthrough
CT: control target
= control target key end

     0   :  { %s1790_s17 = smov 0   ;;  %s1792_s18 = smov 0   ;;  %s1981_s0 = inlined_call_operand.vmem [shape: bf16[2,4,256], index: 0, kind: input, shape index: {}]   ;;  %s1982_s1 = inlined_call_operand.vmem [shape: bf16[2,4,8], index: 1, kind: input, shape index: {}]   ;;  %s1983_s2 = inlined_call_operand.vmem [shape: bf16[32,4], index: 2, kind: input, shape index: {}]   ;;  %s1984_s3 = inlined_call_operand.vmem [shape: f32[32,1], index: 3, kind: input, shape index: {}]   ;;  %s1985_s4 = inlined_call_operand.vmem [shape: bf16[32,32], index: 4, kind: input, shape index: {}]   ;;  %s1986_s5 = inlined_call_operand.vmem [shape: f32[32,1], index: 5, kind: input, shape index: {}]   ;;  %s1987_s6 = inlined_call_operand.vmem [shape: bf16[2,8,256], index: 6, kind: input, shape index: {}]   ;;  %s1988_s7 = inlined_call_operand.vmem [shape: f32[2,1,256], index: 7, kind: input, shape index: {}]   ;;  %s1989_s8 = inlined_call_operand.vmem [shape: s32[2,8,1], index: 8, kind: input, shape index: {}]   ;;  %s1990_s9 = inlined_call_operand.vmem [shape: f32[2,8,1], index: 9, kind: input, shape index: {}]   ;;  %s1991_s10 = inlined_call_operand.vmem [shape: f32[2,8,1], index: 10, kind: input, shape index: {}]   ;;  %s1992_s11 = inlined_call_operand.vmem [shape: f32[2,8,128], index: 11, kind: output, shape index: {}]  }
   0x1   :  { %s1794_s19 = smov 0  }
   0x2 LB: > { %s33_s20 = sadd.s32 1, %s1721_s18  ;;  %p1568_p0 = scmp.ge.s32.totalorder %s1725_s19, 1  ;;  %s1725_s19 = sphi %s1794_s19, %s21_s19   ;;  %s1721_s18 = sphi %s1792_s18, %s1996_s18   ;;  %s1717_s17 = sphi %s1790_s17, %s1995_s17  }
   0x3   : > { %p35_p1 = scmp.ge.s32.totalorder %s33_s20, 2  ;;  %p425_p2 = scmp.lt.s32.totalorder %s1725_s19, 3 }
   0x5   : > { %s1998_s20 = smov (%p35_p1, %s33_s20), 0  ;;  %p426_p3 = pnand %p1568_p0, %p425_p2 }
   0x6   : > { %p502_p4 = scmp.lt.s32.totalorder (!%p426_p3), %s1717_s17, 1  ;;  %v578_v0 = vlaneseq (!%p426_p3)  ;;  %v1671_v1 = vld [vmem:[%s1983_s2] sm:$0xff] (!%p426_p3)   ;;  %vm615_vm0 = vcmask (!%p426_p3), 31744   ;;  %v1727_v3 = vmov (!%p426_p3), 0.0   ;;  %v1728_v4 = vmov (!%p426_p3), 0   ;;  %v557_v5 = vld [vmem:[%s1984_s3 + $0x10] sm:$0xff] (!%p426_p3) }
   0x7   : > { %429 = sbr.rel (%p426_p3) target bundleno = 1239 (0x4d7), region = 64  ;;  %1617 = vmatprep.mubr.msk.bf16.mxu0 (!%p426_p3), %vm615_vm0, %v1671_v1  ;;  %1670 = vset.pattern.permute.xlu1 (!%p426_p3), %v1728_v4  ;;  %v555_v6 = vld [vmem:[%s1984_s3] sm:$0xff] (!%p426_p3)  ;;  %vm622_vm2 = vcmask (!%p426_p3), 1041408   ;;  %v1672_v7 = vld [vmem:[%s1983_s2 + $0x8] sm:$0xff] (!%p426_p3)   ;;  %v558_v8 = vld [vmem:[%s1984_s3 + $0x18] sm:$0xff] (!%p426_p3)  ;;  %vm709_vm4 = vcmask (!%p426_p3), 261120  }
   0x8   : > { %vm1814_vm1 = vcmp.lt.s32.totalorder (!%p426_p3), %v578_v0, 256  ;;  %1669 = vset.pattern.permute.xlu0 (!%p426_p3), %v1728_v4  ;;  %597 = vperm.xlu1 (!%p426_p3), %1670, %v557_v5   ;;  %v556_v11 = vld [vmem:[%s1984_s3 + $0x8] sm:$0xff] (!%p426_p3)  ;;  %v563_v19 = vld [vmem:[%s1986_s5] sm:$0xff] (!%p426_p3)  ;;  %v1882_v21 = vld [vmem:[%s1986_s5 + $0x10] sm:$0xff] (!%p426_p3)  ;;  %vm1089_vm5 = vcmask (!%p426_p3), 1043456   ;;  %vm795_vm7 = vcmask (!%p426_p3), 64512  }
   0x9   : > { %582 = vst.msk [vmem:[#allocation7] sm:$0x3] (!%p426_p3), %vm1814_vm1, %v1727_v3  ;;  %583 = vst.msk [vmem:[#allocation8] sm:$0x3] (!%p426_p3), %vm1814_vm1, %v1727_v3  ;;  %587 = vperm.xlu0 (!%p426_p3), %1669, %v555_v6   ;;  %v564_v20 = vld [vmem:[%s1986_s5 + $0x8] sm:$0xff] (!%p426_p3)  ;;  %v1894_v23 = vld [vmem:[%s1985_s4] sm:$0xff] (!%p426_p3)  }
   0xa   : > { %1625 = vmatprep.mubr.msk.bf16.mxu1 (!%p426_p3), %vm709_vm4, %v1894_v23  ;;  %v1674_v56 = vld [vmem:[%s1985_s4 + $0x8] sm:$0xff] (!%p426_p3)   ;;  %vm873_vm15 = vcmask (!%p426_p3), 7168  }
   0xc   : > { %602 = vperm.xlu1 (!%p426_p3), %1670, %v558_v8  }
   0xd   : > { %592 = vperm.xlu0 (!%p426_p3), %1669, %v556_v11  }
   0xe   : > { %s2000_s17 = smov (!%p502_p4, %s1717_s17), 1 }
   0xf   : > { %s1571_s27 = sshll.u32 %s2000_s17, 1  ;;  %s1606_s28 = sshll.u32 %s2000_s17, 2 }
  0x10   : > { %s514_s12 = scalar_lea.vmem %s1982_s1, %s1571_s27  ;;  %s532_s15 = scalar_lea.vmem %s1988_s7, %s1571_s27  ;;  %v1286_v17 = vld [vmem:[#allocation8] sm:$0x3]  ;;  %883 = vperm.xlu1 %1670, %v556_v11  }
  0x11   : > { %v584_v9 = vld [vmem:[%s514_s12] sm:$0x3]  ;;  %s509_s26 = scalar_lea.vmem %s1981_s0, %s1606_s28  ;;  %878 = vperm.xlu0 %1669, %v555_v6   ;;  %s1877_s14 = sshll.u32 %s2000_s17, 3 }
  0x12   : > { %v1847_v10 = vld [vmem:[%s532_s15] sm:$0x3]  ;;  %1629 = vmatprep.subr.msk.bf16.mxu0 %vm622_vm2, %v584_v9  ;;  %v624_v12 = vsel %vm622_vm2, %v584_v9, 0  ;;  %s537_s23 = scalar_lea.vmem %s1989_s8, %s1877_s14  ;;  %s541_s27 = scalar_lea.vmem %s1990_s9, %s1877_s14 }
  0x13   : > { %vm1230_vm3 = vcmp.gt.f32.partialorder %v1847_v10, 0.0  ;;  %v1590_v13 = vld.sshfl [vmem:[%s509_s26] sm:$0x33 pattern:$0x76325410]  ;;  %1616 = vmatpush3.bf16.msra.mxu0 %v624_v12  ;;  %s523_s13 = scalar_lea.vmem %s1987_s6, %s1877_s14  ;;  %s1963_s25 = scalar_lea.vmem %s1992_s11, %s1877_s14 }
  0x14   : > { %v914_v14 = vcombine.high %v1590_v13, %v1590_v13  ;;  %v924_v15 = vsel %vm622_vm2, %v1590_v13, 0  ;;  %v1860_v16 = vsel %vm1230_vm3, 1.0, %v1727_v3  ;;  %893 = vperm.xlu1 %1670, %v558_v8   ;;  %v831_v22 = vld [vmem:[%s537_s23] sm:$0xff]  ;;  %s545_s23 = scalar_lea.vmem %s1991_s10, %s1877_s14  ;;  %1415 = vst [vmem:[%s1963_s25 + $0x5] sm:$0x7] %v1727_v3 }
  0x15   : > { %v1287_v18 = vadd.f32 %v1860_v16, %v1286_v17  ;;  %888 = vperm.xlu0 %1669, %v557_v5  }
  0x16   : > { %1591 = vmatprep.subr.msk.bf16.mxu0 %vm622_vm2, %v914_v14  ;;  %1618 = vmatmul.mubr.msk.bf16.vlgmr.msra.gmra.mrb[0].mxu0 %vm615_vm0, %v1672_v7 }
  0x17   : > { %930 = vmatpush1.bf16.msra.mxu0 %v924_v15  ;;  %961 = vmatprep.mubr.bf16.mxu0 %v1728_v4  ;;  %1288 = vst.msk [vmem:[#allocation8] sm:$0x3] %vm1814_vm1, %v1287_v18 }
  0x18   : > { %996 = vperm.xlu1 %1670, %v563_v19  }
  0x19   : > { %687 = vperm.xlu0 %1669, %v564_v20  }
  0x1c   : > { %692 = vperm.xlu1 %1670, %v1882_v21  }
  0x1e   : > { %1592 = vmatmul.mubr.msk.bf16.vlgmr.msra.gmra.mrb[4].mxu0 %vm615_vm0, %v1671_v1 }
  0x1f   : > { %971 = vmatprep.mubr.bf16.mxu0 %v1728_v4 }
  0x20   : > { %833 = vperm.xlu1 %1670, %v831_v22  }
  0x26   : > { %1593 = vmatmul.mubr.msk.bf16.gmra.mrb[8].mxu0 %vm615_vm0, %v1672_v7  ;;  %vm1374_vm0 = vcmask 1040384  }
  0x27   : > { %1128 = vmatprep.mubr.bf16.mxu0 %v1728_v4 }
  0x87   : > { %v598_v24 = vpop.permute.xlu1 %597 }
  0x88   : > { %v588_v25 = vpop.permute.xlu0 %587 }
  0x8b   : > { %v603_v27 = vpop.permute.xlu1 %602 }
  0x8c   : > { %v593_v30 = vpop.permute.xlu0 %592 }
  0x8f   : > { %v884_v46 = vpop.permute.xlu1 %883 }
  0x90   : > { %v879_v41 = vpop.permute.xlu0 %878 }
  0x93   : > { %v894_v63 = vpop.permute.xlu1 %893 }
  0x94   : > { %v889_v58 = vpop.permute.xlu0 %888 }
  0x97   : > { %v997_v17 = vpop.permute.xlu1 %996 }
  0x9b   : > { %v693_v18 = vpop.permute.xlu1 %692 }
  0xe9   : > { %v1619_v26 = vpop.f32.mrb[0].mxu0 }
  0xea   : > { %v669_v28 = vadd.f32 %v1619_v26, %v598_v24  ;;  %v660_v29 = vpop.f32.mrb[1].mxu0 }
  0xeb   : > { %v661_v31 = vadd.f32 %v660_v29, %v588_v25  ;;  %v1620_v32 = vpop.f32.mrb[2].mxu0  ;;  %v688_v25 = vpop.permute.xlu0 %687 }
  0xec   : > { %v672_v33 = vadd.f32 %v1620_v32, %v603_v27  ;;  %v663_v34 = vpop.f32.mrb[3].mxu0  ;;  %v677_v36 = vmax.f32 %v669_v28, 0.0 }
  0xed   : > { %v664_v35 = vadd.f32 %v663_v34, %v593_v30  ;;  %v675_v38 = vmax.f32 %v661_v31, 0.0 }
  0xee   : > { %v678_v37 = vmax.f32 %v672_v33, 0.0 }
  0xef   : > { %v676_v39 = vmax.f32 %v664_v35, 0.0 }
  0xf0   : > { %v680_v40 = vpack.c.bf16 %v678_v37, %v677_v36  ;;  %v830_v37 = vand.u32 127, %v578_v0 }
  0xf1   : > { %v963_v42 = vpop.f32.mrb[4].mxu0  ;;  %v679_v43 = vpack.c.bf16 %v676_v39, %v675_v38  ;;  %v834_v38 = vpop.permute.xlu1 %833 }
  0xf2   : > { %v964_v44 = vadd.f32 %v963_v42, %v879_v41  ;;  %v965_v45 = vpop.f32.mrb[5].mxu0  ;;  %vm835_vm6 = vcmp.eq.s32.totalorder %v830_v37, %v834_v38 }
  0xf3   : > { %v966_v47 = vadd.f32 %v965_v45, %v879_v41  ;;  %1621 = vmatprep.subr.bf16.mxu1 %v679_v43  ;;  %v967_v48 = vpop.f32.mrb[6].mxu0  ;;  %v1587_v39 = vsel %vm835_vm6, 1.0, %v1727_v3 }
  0xf4   : > { %v968_v49 = vadd.f32 %v967_v48, %v884_v46  ;;  %1622 = vmatpush3.bf16.msra.mxu1 %v679_v43  ;;  %v969_v50 = vpop.f32.mrb[7].mxu0  ;;  %v982_v52 = vmax.f32 %v964_v44, 0.0 }
  0xf5   : > { %v970_v51 = vadd.f32 %v969_v50, %v884_v46  ;;  %1623 = vmatprep.subr.bf16.mxu1 %v680_v40  ;;  %v983_v54 = vmax.f32 %v966_v47, 0.0 }
  0xf6   : > { %v984_v53 = vmax.f32 %v968_v49, 0.0 }
  0xf7   : > { %v985_v55 = vmax.f32 %v970_v51, 0.0 }
  0xf8   : > { %v990_v57 = vpack.c.bf16 %v984_v53, %v982_v52  ;;  %1624 = vmatpush3.bf16.msra.mxu1 %v680_v40 }
  0xf9   : > { %v991_v59 = vpack.c.bf16 %v985_v55, %v983_v54  ;;  %v973_v60 = vpop.f32.mrb[8].mxu0 }
  0xfa   : > { %v974_v61 = vadd.f32 %v973_v60, %v889_v58  ;;  %v975_v62 = vpop.f32.mrb[9].mxu0  ;;  %v1911_v60 = vshrl.u32 %v578_v0, 7 }
  0xfb   : > { %v976_v1 = vadd.f32 %v975_v62, %v889_v58  ;;  %1626 = vmatmul.mubr.msk.bf16.vlgmr.msra.gmra.mrb[0].mxu1 %vm709_vm4, %v1674_v56  ;;  %v977_v5 = vpop.f32.mrb[10].mxu0  ;;  %1030 = vmatprep.subr.bf16.mxu1 %v991_v59 }
  0xfc   : > { %v978_v6 = vadd.f32 %v977_v5, %v894_v63  ;;  %v979_v7 = vpop.f32.mrb[11].mxu0  ;;  %1031 = vmatpush1.bf16.msra.mxu1 %v990_v57  ;;  %1062 = vmatprep.mubr.bf16.mxu1 %v1728_v4  ;;  %v986_v9 = vmax.f32 %v974_v61, 0.0  ;;  %vm1170_vm8 = vcmp.lt.s32.totalorder %v1911_v60, 5 }
  0xfd   : > { %v980_v8 = vadd.f32 %v979_v7, %v894_v63  ;;  %v987_v12 = vmax.f32 %v976_v1, 0.0 }
  0xfe   : > { %v988_v11 = vmax.f32 %v978_v6, 0.0 }
  0xff   : > { %v989_v13 = vmax.f32 %v980_v8, 0.0 }
 0x100   : > { %v992_v14 = vpack.c.bf16 %v988_v11, %v986_v9 }
 0x101   : > { %v993_v15 = vpack.c.bf16 %v989_v13, %v987_v12 }
 0x103   : > { %1032 = vmatprep.subr.bf16.mxu1 %v993_v15 }
 0x104   : > { %1033 = vmatpush1.bf16.msra.mxu1 %v992_v14 }
 0x107   : > { %1596 = vmatmul.mubr.msk.bf16.vlgmr.msra.gmra.mrb[4].mxu1 %vm709_vm4, %v1894_v23 }
 0x108   : > { %1070 = vmatprep.mubr.bf16.mxu1 %v1728_v4 }
 0x10f   : > { %1597 = vmatmul.mubr.msk.bf16.gmra.mrb[8].mxu1 %vm709_vm4, %v1674_v56 }
 0x1ce   : > { %v1627_v19 = vpop.f32.mrb[0].mxu1 }
 0x1cf   : > { %v758_v20 = vadd.f32 %v1627_v19, %v693_v18  ;;  %v750_v22 = vpop.f32.mrb[1].mxu1 }
 0x1d0   : > { %v1628_v24 = vpop.f32.mrb[2].mxu1 }
 0x1d1   : > { %797 = vxpose.xlu1.b32.start.end [1/1] (short) (narrow) %v758_v20, 8  ;;  %v752_v26 = vpop.f32.mrb[3].mxu1 }
 0x1d2   : > { %v753_v27 = vadd.f32 %v752_v26, %v688_v25 }
 0x1d4   : > { %763 = vxpose.xlu0.b32.start.end [1/1] (short) (narrow) %v753_v27, 8 }
 0x1da   : > { %v1064_v28 = vpop.f32.mrb[4].mxu1 }
 0x1db   : > { %v1065_v29 = vadd.f32 %v1064_v28, %v997_v17  ;;  %v1066_v30 = vpop.f32.mrb[5].mxu1 }
 0x1dc   : > { %v1067_v23 = vadd.f32 %v1066_v30, %v997_v17  ;;  %v1068_v31 = vpop.f32.mrb[6].mxu1  ;;  %v1602_v30 = vsel %vm1170_vm8, 1.0, %v1727_v3 }
 0x1dd   : > { %v1083_v4 = vpack.c.bf16 %v1065_v29, %v1065_v29  ;;  %v1069_v32 = vpop.f32.mrb[7].mxu1 }
 0x1de   : > { %v1084_v33 = vpack.c.bf16 %v1067_v23, %v1067_v23 }
 0x1df   : > { %v1091_v34 = vsel %vm1089_vm5, %v1083_v4, 0 }
 0x1e0   : > { %1598 = vmatprep.subr.msk.bf16.mxu0 %vm1089_vm5, %v1084_v33 }
 0x1e1   : > { %1097 = vmatpush1.bf16.msra.mxu0 %v1091_v34 }
 0x1e2   : > { %v1072_v35 = vpop.f32.mrb[8].mxu1 }
 0x1e3   : > { %v1074_v36 = vpop.f32.mrb[9].mxu1 }
 0x1e4   : > { %v1919_v38 = vpop.f32.mrb[10].mxu1 }
 0x1ef   : > { %1005 = vperm.xlu1 %1670, %v1882_v21  }
 0x251   : > { %v813_v40 = vpop.trf.xlu1 }
 0x252   : > { %v838_v41 = vmul.f32 %v1587_v39, %v813_v40  ;;  %v1921_v39 = vpop.f32.mrb[11].mxu1 }
 0x254   : > { %v779_v42 = vpop.trf.xlu0  ;;  %v839_v43 = vsel %vm795_vm7, %v838_v41, 0.0 }
 0x255   : > { %796 = vst.msk [vmem:[#allocation2] sm:$0xff] %vm795_vm7, %v779_v42  ;;  %840 = vadd.xlane.f32.xlu0 %v839_v43 }
 0x25c   : > { %v1081_v44 = vld [vmem:[#allocation2] sm:$0xff] }
 0x25d   : > { %v1082_v45 = vpack.c.bf16 %v1081_v44, %v1081_v44 }
 0x25f   : > { %1599 = vmatmul.mubr.msk.bf16.vlgmr.msra.gmra.mrb[12].mxu0 %vm795_vm7, %v1082_v45 }
 0x26e   : > { %v1006_v46 = vpop.permute.xlu1 %1005 }
 0x26f   : > { %v1073_v47 = vadd.f32 %v1072_v35, %v1006_v46  ;;  %v1075_v48 = vadd.f32 %v1074_v36, %v1006_v46 }
 0x271   : > { %v1173_v21 = vand.u32 2147483647, %v1073_v47  ;;  %v1174_v49 = vand.u32 2147483647, %v1075_v48  ;;  %vm1187_vm9 = vcmp.ge.f32.partialorder %v1073_v47, 0.0  ;;  %v1193_v9 = vmax.f32 %v1073_v47, 0.0 }
 0x272   : > { %vm1188_vm10 = vcmp.ge.f32.partialorder %v1075_v48, 0.0  ;;  %v1194_v20 = vmax.f32 %v1075_v48, 0.0 }
 0x273   : > { %v1175_v50 = vsub.f32 0.0, %v1173_v21  ;;  %v1176_v51 = vsub.f32 0.0, %v1174_v49 }
 0x275   : > { %v1177_v52 = vmul.f32 1.442695, %v1175_v50  ;;  %v1179_v53 = vmul.f32 1.442695, %v1176_v51 }
 0x277   : > { %1675 = vpow2.f32 %v1177_v52 }
 0x278   : > { %1677 = vpow2.f32 %v1179_v53 }
 0x281   : > { %v1676_v54 = vpop.eup %1675 }
 0x282   : > { %v1678_v55 = vpop.eup %1677  ;;  %v1181_v56 = vadd.f32 1.0, %v1676_v54  ;;  %v1198_v59 = vmul.f32 -0.5, %v1676_v54  ;;  %v1201_v7 = vand.u32 2147483647, %v1676_v54 }
 0x283   : > { %v1182_v57 = vadd.f32 1.0, %v1678_v55  ;;  %v1207_v58 = vmul.f32 -0.5, %v1678_v55  ;;  %v1210_v62 = vand.u32 2147483647, %v1678_v55 }
 0x284   : > { %1679 = vrcp.f32 %v1181_v56  ;;  %v1199_v1 = vadd.f32 1.0, %v1198_v59  ;;  %vm1202_vm12 = vcmp.lt.f32.partialorder %v1201_v7, 0.0004427343 }
 0x285   : > { %1681 = vrcp.f32 %v1182_v57  ;;  %v1208_v61 = vadd.f32 1.0, %v1207_v58  ;;  %vm1211_vm11 = vcmp.lt.f32.partialorder %v1210_v62, 0.0004427343  ;;  %v1927_v62 = vld [vmem:[%s541_s27] sm:$0xff] }
 0x286   : > { %1683 = vlog2.f32 %v1182_v57  ;;  %v1200_v18 = vmul.f32 %v1676_v54, %v1199_v1 }
 0x287   : > { %1685 = vlog2.f32 %v1181_v56  ;;  %v1209_v14 = vmul.f32 %v1678_v55, %v1208_v61 }
 0x28e   : > { %v1680_v63 = vpop.eup %1679 }
 0x28f   : > { %v1682_v5 = vpop.eup %1681  ;;  %v1189_v6 = vmul.f32 %v1680_v63, %v1676_v54 }
 0x290   : > { %v1684_v8 = vpop.eup %1683  ;;  %v1190_v11 = vmul.f32 %v1682_v5, %v1678_v55 }
 0x291   : > { %v1686_v12 = vpop.eup %1685  ;;  %v1206_v13 = vmul.f32 0.6931472, %v1684_v8  ;;  %v1191_v0 = vsel %vm1187_vm9, %v1680_v63, %v1189_v6 }
 0x292   : > { %v1192_v15 = vsel %vm1188_vm10, %v1682_v5, %v1190_v11  ;;  %v1197_v17 = vmul.f32 0.6931472, %v1686_v12  ;;  %v1215_v19 = vmul.f32 0.75, %v1191_v0 }
 0x293   : > { %v1212_v22 = vsel %vm1211_vm11, %v1209_v14, %v1206_v13  ;;  %v1216_v24 = vmul.f32 0.75, %v1192_v15 }
 0x294   : > { %v1203_v25 = vsel %vm1202_vm12, %v1200_v18, %v1197_v17  ;;  %v1217_v26 = vmul.f32 %v1215_v19, %v1191_v0  ;;  %v1214_v27 = vadd.f32 %v1212_v22, %v1194_v20 }
 0x295   : > { %v1213_v28 = vadd.f32 %v1203_v25, %v1193_v9  ;;  %v1218_v29 = vmul.f32 %v1216_v24, %v1192_v15  ;;  %v1149_v15 = vld [vmem:[%s523_s13] sm:$0xff] }
 0x296   : > { %v1150_v17 = vunpack.c.l.bf16 %v1149_v15  ;;  %v1151_v18 = vunpack.c.h.bf16 %v1149_v15 }
 0x297   : > { %v1219_v23 = vmul.f32 %v1217_v26, %v1213_v28  ;;  %v1220_v31 = vmul.f32 %v1218_v29, %v1214_v27  ;;  %v1324_v29 = vsel %vm873_vm15, %v1927_v62, 0.0 }
 0x299   : > { %v1223_v4 = vmul.f32 %v1602_v30, %v1219_v23  ;;  %v1224_v32 = vmul.f32 %v1602_v30, %v1220_v31  ;;  %v566_v31 = vld [vmem:[%s1986_s5 + $0x18] sm:$0xff] }
 0x29b   : > { %v1917_v33 = vadd.f32 %v1224_v32, %v1223_v4  ;;  %v1304_v4 = vld [vmem:[%s545_s23] sm:$0xff] }
 0x2e2   : > { %v841_v34 = vpop.xlane.xlu0 %840 }
 0x2e3   : > { %v842_v35 = vand.u32 2147483647, %v841_v34  ;;  %vm849_vm13 = vcmp.ge.f32.partialorder %v841_v34, 0.0  ;;  %v852_v50 = vmax.f32 %v841_v34, 0.0 }
 0x2e5   : > { %v843_v36 = vsub.f32 0.0, %v842_v35  ;;  %v1236_v35 = vsub.s32 0, %v1911_v60 }
 0x2e7   : > { %v844_v37 = vmul.f32 1.442695, %v843_v36 }
 0x2e9   : > { %1687 = vpow2.f32 %v844_v37  ;;  %v1237_v37 = vrot.slane %v1847_v10, %v1236_v35 }
 0x2f3   : > { %v1688_v40 = vpop.eup %1687 }
 0x2f4   : > { %v846_v41 = vadd.f32 1.0, %v1688_v40  ;;  %v856_v42 = vmul.f32 -0.5, %v1688_v40  ;;  %v859_v44 = vand.u32 2147483647, %v1688_v40 }
 0x2f6   : > { %1689 = vrcp.f32 %v846_v41  ;;  %v857_v43 = vadd.f32 1.0, %v856_v42  ;;  %vm860_vm14 = vcmp.lt.f32.partialorder %v859_v44, 0.0004427343  ;;  %v1729_v42 = vmov 1966171168  }
 0x2f7   : > { %1691 = vlog2.f32 %v846_v41 }
 0x2f8   : > { %v858_v21 = vmul.f32 %v1688_v40, %v857_v43  ;;  %v1266_v43 = vunpack.c.l.s4 %v1729_v42 }
 0x300   : > { %v1690_v45 = vpop.eup %1689 }
 0x301   : > { %v1692_v46 = vpop.eup %1691  ;;  %v850_v47 = vmul.f32 %v1690_v45, %v1688_v40 }
 0x302   : > { %v855_v48 = vmul.f32 0.6931472, %v1692_v46 }
 0x303   : > { %v851_v49 = vsel %vm849_vm13, %v1690_v45, %v850_v47  ;;  %v1250_v45 = vrot.slane %v1860_v16, %v1236_v35 }
 0x304   : > { %v861_v51 = vsel %vm860_vm14, %v858_v21, %v855_v48  ;;  %v864_v52 = vmul.f32 0.75, %v851_v49  ;;  %v867_v53 = vsub.f32 1.0, %v851_v49 }
 0x305   : > { %v862_v54 = vadd.f32 %v861_v51, %v852_v50 }
 0x306   : > { %v865_v55 = vmul.f32 %v864_v52, %v851_v49  ;;  %v868_v56 = vmul.f32 0.25, %v867_v53  ;;  %v1267_v49 = vunpack.c.0.s8 %v1266_v43 }
 0x307   : > { %v863_v57 = vsub.f32 %v862_v54, %v841_v34 }
 0x308   : > { %v869_v58 = vmul.f32 %v868_v56, %v867_v53  ;;  %v866_v61 = vmul.f32 %v865_v55, %v862_v54  ;;  %v1270_v55 = vsub.s32 %v1267_v49, %v1911_v60 }
 0x30a   : > { %v870_v59 = vmul.f32 %v869_v58, %v863_v57 }
 0x30c   : > { %v871_v63 = vsub.f32 %v870_v59, %v866_v61 }
 0x30e   : > { %v872_v1 = vmul.f32 %v871_v63, %v1927_v62  ;;  %v1259_v63 = vld [vmem:[#allocation7] sm:$0x3] }
 0x310   : > { %874 = vst.msk [vmem:[#allocation3] sm:$0xff] %vm873_vm15, %v872_v1 }
 0x317   : > { %v1348_v30 = vld [vmem:[#allocation3] sm:$0xff] }
 0x318   : > { %v1349_v23 = vsel %vm873_vm15, %v1348_v30, 0.0 }
 0x332   : > { %v1130_v5 = vpop.f32.mrb[12].mxu0 }
 0x333   : > { %v1600_v6 = vmul.f32 -1.442695, %v1130_v5  ;;  %v1132_v7 = vpop.f32.mrb[13].mxu0 }
 0x334   : > { %v1601_v8 = vmul.f32 -1.442695, %v1132_v7  ;;  %v1134_v9 = vpop.f32.mrb[14].mxu0 }
 0x335   : > { %1693 = vpow2.f32 %v1600_v6  ;;  %v1135_v11 = vpop.f32.mrb[15].mxu0  ;;  %v1389_v6 = vld [vmem:[#allocation8] sm:$0x3] }
 0x336   : > { %1695 = vpow2.f32 %v1601_v8 }
 0x33f   : > { %v1694_v12 = vpop.eup %1693 }
 0x340   : > { %v1696_v13 = vpop.eup %1695  ;;  %v1143_v14 = vadd.f32 1.0, %v1694_v12 }
 0x341   : > { %v1144_v0 = vadd.f32 1.0, %v1696_v13 }
 0x342   : > { %1697 = vrcp.f32 %v1143_v14 }
 0x343   : > { %1699 = vrcp.f32 %v1144_v0 }
 0x34c   : > { %v1698_v19 = vpop.eup %1697 }
 0x34d   : > { %v1700_v20 = vpop.eup %1699  ;;  %v1162_v22 = vmul.f32 %v1698_v19, %v1698_v19  ;;  %v1154_v24 = vmul.f32 %v1698_v19, %v1150_v17 }
 0x34e   : > { %v1163_v25 = vmul.f32 %v1700_v20, %v1700_v20  ;;  %v1155_v26 = vmul.f32 %v1700_v20, %v1151_v18 }
 0x350   : > { %v1299_v27 = vadd.f32 %v1163_v25, %v1162_v22  ;;  %v1294_v28 = vadd.f32 %v1155_v26, %v1154_v24 }
 0x352   : > { %1300 = vadd.xlane.f32.xlu0 %v1299_v27  ;;  %1295 = vadd.xlane.f32.xlu1 %v1294_v28 }
 0x356   : > { %1325 = vadd.xlane.f32.xlu1 %v1324_v29 }
 0x35a   : > { %1339 = vadd.xlane.f32.xlu1 %v1917_v33  ;;  %v1240_v33 = vsub.s32 1, %v1911_v60  ;;  %v1394_v60 = vrot.slane %v1389_v6, %v1236_v35 }
 0x35c   : > { %v1241_v40 = vrot.slane %v1847_v10, %v1240_v33  ;;  %v1254_v46 = vrot.slane %v1860_v16, %v1240_v33  ;;  %v1398_v7 = vrot.slane %v1389_v6, %v1240_v33  ;;  %v1401_v14 = vsel %vm1374_vm0, %v1394_v60, 0.0 }
 0x35e   : > { %1350 = vadd.xlane.f32.xlu1 %v1349_v23 }
 0x368   : > { %1010 = vperm.xlu0 %1669, %v566_v31  }
 0x3df   : > { %v1301_v32 = vpop.xlane.xlu0 %1300  ;;  %v1296_v41 = vpop.xlane.xlu1 %1295 }
 0x3e0   : > { %v1305_v34 = vadd.f32 %v1304_v4, %v1301_v32  ;;  %v1302_v21 = vmul.f32 2.0, %v1296_v41 }
 0x3e2   : > { %v1306_v36 = vadd.f32 1e-06, %v1305_v34  ;;  %v1303_v54 = vadd.f32 1e-06, %v1302_v21 }
 0x3e3   : > { %v1326_v2 = vpop.xlane.xlu1 %1325 }
 0x3e4   : > { %1701 = vrcp.f32 %v1306_v36  ;;  %v1327_v19 = vrot.slane %v1326_v2, 4 }
 0x3e6   : > { %v1328_v24 = vadd.f32 %v1327_v19, %v1326_v2 }
 0x3e7   : > { %v1011_v44 = vpop.permute.xlu0 %1010  ;;  %v1340_v17 = vpop.xlane.xlu1 %1339 }
 0x3e8   : > { %v1077_v47 = vadd.f32 %v1919_v38, %v1011_v44  ;;  %v1079_v48 = vadd.f32 %v1921_v39, %v1011_v44  ;;  %v1341_v20 = vrot.slane %v1340_v17, 4  ;;  %v1329_v27 = vrot.slane %v1328_v24, 2 }
 0x3ea   : > { %v1244_v50 = vsub.f32 %v1077_v47, %v1237_v37  ;;  %v1245_v51 = vsub.f32 %v1079_v48, %v1241_v40  ;;  %v1342_v25 = vadd.f32 %v1341_v20, %v1340_v17  ;;  %v1330_v4 = vadd.f32 %v1329_v27, %v1328_v24 }
 0x3eb   : > { %v1351_v18 = vpop.xlane.xlu1 %1350 }
 0x3ec   : > { %v1257_v52 = vmul.f32 %v1250_v45, %v1244_v50  ;;  %v1258_v53 = vmul.f32 %v1254_v46, %v1245_v51  ;;  %v1352_v22 = vrot.slane %v1351_v18, 4  ;;  %v1343_v29 = vrot.slane %v1342_v25, 2 }
 0x3ee   : > { %v1702_v10 = vpop.eup %1701  ;;  %v1260_v56 = vmul.f32 %v1257_v52, %v1257_v52  ;;  %v1261_v57 = vmul.f32 %v1258_v53, %v1258_v53  ;;  %v1353_v26 = vadd.f32 %v1352_v22, %v1351_v18  ;;  %v1344_v34 = vadd.f32 %v1343_v29, %v1342_v25 }
 0x3ef   : > { %v1308_v58 = vmul.f32 %v1702_v10, %v1303_v54 }
 0x3f0   : > { %v1264_v59 = vcombine.low %v1260_v56, %v1261_v57  ;;  %v1354_v23 = vrot.slane %v1353_v26, 2  ;;  %v1345_v37 = vrot.slane %v1344_v34, 1 }
 0x3f1   : > { %v1309_v61 = vsub.f32 1.0, %v1308_v58 }
 0x3f2   : > { %v1271_v16 = vrot.slane %v1264_v59, %v1270_v55  ;;  %v1346_v43 = vadd.f32 %v1345_v37, %v1344_v34 }
 0x3f3   : > { %v1310_v38 = vmul.f32 %v1309_v61, %v1927_v62  ;;  %v1402_v62 = vsel %vm1374_vm0, %v1398_v7, 0.0 }
 0x3f4   : > { %v1278_v39 = vrot.slane %v1271_v16, %v1270_v55  ;;  %v1403_v15 = vadd.f32 %v1402_v62, %v1401_v14 }
 0x3f5   : > { %v1312_v1 = vsel %vm873_vm15, %v1310_v38, 0.0 }
 0x3f6   : > { %v1280_v5 = vadd.f32 %v1278_v39, %v1259_v63  ;;  %1313 = vadd.xlane.f32.xlu0 %v1312_v1 }
 0x3f8   : > { %1285 = vst.msk [vmem:[#allocation7] sm:$0x3] %vm1814_vm1, %v1280_v5 }
 0x3ff   : > { %v1362_v8 = vld [vmem:[#allocation7] sm:$0x3] }
 0x400   : > { %v1367_v9 = vrot.slane %v1362_v8, %v1236_v35  ;;  %v1371_v11 = vrot.slane %v1362_v8, %v1240_v33  ;;  %v1355_v35 = vadd.f32 %v1354_v23, %v1353_v26  ;;  %v1331_v33 = vrot.slane %v1330_v4, 1 }
 0x402   : > { %v1375_v12 = vsel %vm1374_vm0, %v1367_v9, 0.0  ;;  %v1376_v13 = vsel %vm1374_vm0, %v1371_v11, 0.0  ;;  %v1356_v40 = vrot.slane %v1355_v35, 1  ;;  %v1332_v42 = vadd.f32 %v1331_v33, %v1330_v4 }
 0x403   : > { %v1377_v0 = vadd.f32 %v1376_v13, %v1375_v12 }
 0x404   : > { %v1357_v44 = vadd.f32 %v1356_v40, %v1355_v35 }
 0x405   : > { %1378 = vadd.xlane.f32.xlu1 %v1377_v0 }
 0x409   : > { %1404 = vadd.xlane.f32.xlu1 %v1403_v15 }
 0x483   : > { %v1314_v28 = vpop.xlane.xlu0 %1313 }
 0x484   : > { %v1315_v30 = vrot.slane %v1314_v28, 4 }
 0x486   : > { %v1316_v31 = vadd.f32 %v1315_v30, %v1314_v28 }
 0x488   : > { %v1317_v32 = vrot.slane %v1316_v31, 2 }
 0x48a   : > { %v1318_v3 = vadd.f32 %v1317_v32, %v1316_v31 }
 0x48c   : > { %v1319_v36 = vrot.slane %v1318_v3, 1 }
 0x48e   : > { %v1320_v41 = vadd.f32 %v1319_v36, %v1318_v3 }
 0x490   : > { %1630 = vpush %v1320_v41 }
 0x491   : > { %1632 = vpush %v1332_v42 }
 0x492   : > { %1634 = vpush %v1346_v43  ;;  %v1379_v45 = vpop.xlane.xlu1 %1378 }
 0x493   : > { %1636 = vpush %v1357_v44  ;;  %v1380_v46 = vrot.slane %v1379_v45, 4 }
 0x495   : > { %v1381_v47 = vadd.f32 %v1380_v46, %v1379_v45 }
 0x496   : > { %v1405_v48 = vpop.xlane.xlu1 %1404 }
 0x497   : > { %v1382_v21 = vrot.slane %v1381_v47, 2  ;;  %v1406_v49 = vrot.slane %v1405_v48, 4 }
 0x499   : > { %v1407_v50 = vadd.f32 %v1406_v49, %v1405_v48  ;;  %v1383_v51 = vadd.f32 %v1382_v21, %v1381_v47 }
 0x49b   : > { %v1408_v52 = vrot.slane %v1407_v50, 2  ;;  %v1384_v53 = vrot.slane %v1383_v51, 1 }
 0x49d   : > { %v1409_v54 = vadd.f32 %v1408_v52, %v1407_v50  ;;  %v1385_v10 = vadd.f32 %v1384_v53, %v1383_v51 }
 0x49f   : > { %1638 = vpush %v1385_v10  ;;  %v1410_v55 = vrot.slane %v1409_v54, 1 }
 0x4a1   : > { %v1411_v56 = vadd.f32 %v1410_v55, %v1409_v54 }
 0x4a3   : > { %1640 = vpush %v1411_v56 }
 0x4c1   : > { %s1631_s14 = spop %1630 }
 0x4c2   : > { %v1322_v57 = vstv %s1631_s14  ;;  %s1633_s26 = spop %1632 }
 0x4c3   : > { %1323 = vst [vmem:[%s1963_s25] sm:$0x1] %v1322_v57  ;;  %v1334_v58 = vstv %s1633_s26  ;;  %s1635_s29 = spop %1634 }
 0x4c4   : > { %1335 = vst [vmem:[%s1963_s25 + $0x1] sm:$0x1] %v1334_v58  ;;  %s1637_s30 = spop %1636 }
 0x4c5   : > { %s1359_s27 = sadd.f32 %s1637_s30, %s1635_s29 }
 0x4c7   : > { %v1360_v59 = vstv %s1359_s27 }
 0x4c8   : > { %1361 = vst [vmem:[%s1963_s25 + $0x2] sm:$0x1] %v1360_v59 }
 0x4d0   : > { %s1639_s28 = spop %1638 }
 0x4d1   : > { %v1387_v61 = vstv %s1639_s28 }
 0x4d2   : > { %1388 = vst [vmem:[%s1963_s25 + $0x3] sm:$0x1] %v1387_v61 }
 0x4d4   : > { %s1641_s12 = spop %1640 }
 0x4d5   : > { %v1413_v16 = vstv %s1641_s12 }
 0x4d6   : > { %1414 = vst [vmem:[%s1963_s25 + $0x4] sm:$0x1] %v1413_v16 }
 0x4d7 PF: > { %s21_s19 = sadd.s32 1, %s1725_s19   ;;  %s1995_s17 = smov %s1721_s18 }
 0x4d8   : > { %p18_p5 = scmp.ge.s32.totalorder %s21_s19, 4   ;;  %s1996_s18 = smov %s1998_s20 }
 0x4da   :  { %20 = sbr.rel (!%p18_p5) target bundleno = 2 (0x2), region = 120 }

</bundles_post_ra>
